<compile_context>
chip_gen: v5e
topology: v5e:2x2
jax: 0.10.0
libtpu: 0.0.40
codegen_flags: <defaults>
</compile_context>

<pallas_src>
import jax
import jax.numpy as jnp
from jax import lax
from jax.experimental import pallas as pl
from jax.experimental.pallas import tpu as pltpu


def _round_up(x, m):
    return ((x + m - 1) // m) * m


# ---------------------------------------------------------------------------
# Kernel A: fused-gather path (tables VMEM-resident, indices streamed).
# ---------------------------------------------------------------------------
def _fused_onehot_kernel(uid_ref, iid_ref, utab_ref, itab_ref, o_ref):
    # uid_ref / iid_ref : (TB, 1) int32 index blocks
    # utab_ref          : (num_users, D) table, resident in VMEM
    # itab_ref          : (num_items, D) table, resident in VMEM
    # o_ref             : (TB, 1) f32
    TB = uid_ref.shape[0]
    nu = utab_ref.shape[0]
    ni = itab_ref.shape[0]
    uid = uid_ref[...]                                            # (TB, 1)
    iid = iid_ref[...]                                            # (TB, 1)
    # One-hot gather on the otherwise-idle MXU (exact row selection).
    u1h = (lax.broadcasted_iota(jnp.int32, (TB, nu), 1) == uid).astype(jnp.float32)
    i1h = (lax.broadcasted_iota(jnp.int32, (TB, ni), 1) == iid).astype(jnp.float32)
    u = jnp.dot(u1h, utab_ref[...].astype(jnp.float32),
                preferred_element_type=jnp.float32)                # (TB, D)
    v = jnp.dot(i1h, itab_ref[...].astype(jnp.float32),
                preferred_element_type=jnp.float32)                # (TB, D)
    # VPU multiply + cross-lane reduce over the (small) embed dim.
    o_ref[...] = jnp.sum(u * v, axis=1, keepdims=True)


def _fused_pallas(user_table, item_table, users, items, *, tb_max):
    B = users.shape[0]
    nu, D = user_table.shape
    ni = item_table.shape[0]

    # Keep the per-step one-hot scratch (TB x max(nu, ni) f32) modest (~4 MiB).
    onehot_budget = 4 * 1024 * 1024
    tb_cap = max(128, (onehot_budget // (4 * max(nu, ni))) // 128 * 128)
    # >= 2 grid steps when possible (v7x megacore sharding of the batch axis).
    TB = min(tb_max, tb_cap, _round_up(max(pl.cdiv(B, 2), 1), 128))
    grid = pl.cdiv(B, TB)

    uid = users.astype(jnp.int32).reshape(B, 1)
    iid = items.astype(jnp.int32).reshape(B, 1)

    out = pl.pallas_call(
        _fused_onehot_kernel,
        out_shape=jax.ShapeDtypeStruct((B, 1), jnp.float32),
        grid_spec=pl.GridSpec(
            grid=(grid,),
            in_specs=[
                pl.BlockSpec((TB, 1), lambda i: (i, 0)),   # user ids
                pl.BlockSpec((TB, 1), lambda i: (i, 0)),   # item ids
                pl.BlockSpec((nu, D), lambda i: (0, 0)),   # user table (resident)
                pl.BlockSpec((ni, D), lambda i: (0, 0)),   # item table (resident)
            ],
            out_specs=pl.BlockSpec((TB, 1), lambda i: (i, 0)),
        ),
        compiler_params=pltpu.CompilerParams(
            dimension_semantics=("parallel",)),
    )(uid, iid, user_table, item_table)
    return out[:, 0]


# ---------------------------------------------------------------------------
# Kernel B: split path — XLA does the embedding gather, Pallas does the
# per-row dot on (TB, D) blocks in the gather's natural layout (no transpose,
# no pad; ragged tail handled by the cdiv grid + masked output writes).
# ---------------------------------------------------------------------------
def _rowdot_kernel(u_ref, v_ref, o_ref):
    u = u_ref[...].astype(jnp.float32)
    v = v_ref[...].astype(jnp.float32)
    o_ref[...] = jnp.sum(u * v, axis=1, keepdims=True)


def _rowdot_pallas(u, v, *, tb_max):
    B, D = u.shape
    TB = min(tb_max, _round_up(max(pl.cdiv(B, 2), 1), 128))
    grid = pl.cdiv(B, TB)
    out = pl.pallas_call(
        _rowdot_kernel,
        out_shape=jax.ShapeDtypeStruct((B, 1), jnp.float32),
        grid_spec=pl.GridSpec(
            grid=(grid,),
            in_specs=[
                pl.BlockSpec((TB, D), lambda i: (i, 0)),
                pl.BlockSpec((TB, D), lambda i: (i, 0)),
            ],
            out_specs=pl.BlockSpec((TB, 1), lambda i: (i, 0)),
        ),
        compiler_params=pltpu.CompilerParams(
            dimension_semantics=("parallel",)),
    )(u, v)
    return out[:, 0]


# ---------------------------------------------------------------------------
# Forward dispatcher.
# ---------------------------------------------------------------------------
def gbpr_forward(user_table, item_table, users, items, *,
                 tb_max=16384,
                 min_pallas_batch=8192,
                 max_fused_table_rows=4096,
                 max_fused_table_bytes=8 * 1024 * 1024):
    """user_table: (num_users, D), item_table: (num_items, D), f32 or bf16.
    users/items: (B,) int indices.  Returns (B,) float32 scores."""
    assert users.shape[0] == items.shape[0]
    B = users.shape[0]

    # Small-batch fallback: XLA fuses gather+mul+reduce into one pass; the
    # pallas_call launch + relayout overhead would dominate below ~8-16K rows.
    if B < min_pallas_batch:
        u = jnp.take(user_table, users, axis=0).astype(jnp.float32)
        v = jnp.take(item_table, items, axis=0).astype(jnp.float32)
        return jnp.sum(u * v, axis=-1)

    nu, D = user_table.shape
    ni = item_table.shape[0]
    table_bytes = (user_table.size * user_table.dtype.itemsize
                   + item_table.size * item_table.dtype.itemsize)

    # Fused-gather path: tables stay VMEM-resident, only indices are streamed.
    if max(nu, ni) <= max_fused_table_rows and table_bytes <= max_fused_table_bytes:
        return _fused_pallas(user_table, item_table, users, items, tb_max=tb_max)

    # Large tables: XLA gather (glue) + Pallas row-dot in natural layout.
    # TODO(synk): for big tables, replace the XLA gather with an in-kernel
    # jnp.take on a VMEM-resident table shard or a manual per-row DMA gather.
    u = jnp.take(user_table, users, axis=0)
    v = jnp.take(item_table, items, axis=0)
    return _rowdot_pallas(u, v, tb_max=tb_max)


def xavier_uniform(key, shape):
    fan_in, fan_out = shape
    bound = jnp.sqrt(6.0 / (fan_in + fan_out))
    return jax.random.uniform(key, shape, jnp.float32, -bound, bound)


if __name__ == "__main__":
    num_users, num_items, embed_dim = 64, 128, 32
    key = jax.random.PRNGKey(0)
    k_u, k_i, k_uid, k_iid = jax.random.split(key, 4)

    # Deterministic parameter init (matches nn.init.xavier_uniform_ scheme).
    user_embeddings = xavier_uniform(k_u, (num_users, embed_dim))
    item_embeddings = xavier_uniform(k_i, (num_items, embed_dim))

    def ref(ut, it, us, its):
        return jnp.sum(ut[us].astype(jnp.float32) * it[its].astype(jnp.float32),
                       axis=-1)

    # (a) Tiny batch (B=8): exercises the XLA small-batch fallback.
    users = jax.random.randint(k_uid, (8,), 0, num_users, dtype=jnp.int32)
    items = jax.random.randint(k_iid, (8,), 0, num_items, dtype=jnp.int32)
    p_a = jax.block_until_ready(
        gbpr_forward(user_embeddings, item_embeddings, users, items))
    assert p_a.shape == (8,)
    assert jnp.allclose(p_a, ref(user_embeddings, item_embeddings, users, items),
                        atol=1e-5, rtol=1e-5)

    # (b) Fused-gather Pallas kernel (tables VMEM-resident, one-hot MXU gather).
    users = jax.random.randint(k_uid, (512,), 0, num_users, dtype=jnp.int32)
    items = jax.random.randint(k_iid, (512,), 0, num_items, dtype=jnp.int32)
    p_b = jax.block_until_ready(
        gbpr_forward(user_embeddings, item_embeddings, users, items,
                     min_pallas_batch=0))
    assert p_b.shape == (512,)
    assert jnp.allclose(p_b, ref(user_embeddings, item_embeddings, users, items),
                        atol=2e-2, rtol=2e-2)

    # (c) Split-path Pallas kernel with a ragged batch (exercises the no-pad
    #     cdiv grid) and bf16 tables (exercises the in-kernel upcast).
    ut_bf16 = user_embeddings.astype(jnp.bfloat16)
    it_bf16 = item_embeddings.astype(jnp.bfloat16)
    users = jax.random.randint(k_uid, (300,), 0, num_users, dtype=jnp.int32)
    items = jax.random.randint(k_iid, (300,), 0, num_items, dtype=jnp.int32)
    p_c = jax.block_until_ready(
        gbpr_forward(ut_bf16, it_bf16, users, items,
                     min_pallas_batch=0, max_fused_table_rows=0))
    assert p_c.shape == (300,)
    assert jnp.allclose(p_c, ref(ut_bf16, it_bf16, users, items),
                        atol=1e-4, rtol=1e-4)

    print("KERNEL_OK")
</pallas_src>

<mosaic_0001>
module attributes {stable_mosaic.version = 11 : i64} {
  func.func @_fused_onehot_kernel(%arg0: i32, %arg1: memref<256x1xi32, #tpu.memory_space<vmem>>, %arg2: memref<256x1xi32, #tpu.memory_space<vmem>>, %arg3: memref<64x32xf32, #tpu.memory_space<vmem>>, %arg4: memref<128x32xf32, #tpu.memory_space<vmem>>, %arg5: memref<256x1xf32, #tpu.memory_space<vmem>>) attributes {dimension_semantics = [#tpu.dimension_semantics<parallel>], iteration_bounds = array<i64: 2>, scalar_prefetch = 0 : i64, scratch_operands = 0 : i64, tpu.core_type = #tpu.core_type<tc>, window_params = [{transform_indices = @transform_0, window_bounds = array<i64: 256, 1>}, {transform_indices = @transform_1, window_bounds = array<i64: 256, 1>}, {pipeline_mode = #tpu.pipeline_mode<synchronous>, transform_indices = @transform_2, window_bounds = array<i64: 64, 32>}, {pipeline_mode = #tpu.pipeline_mode<synchronous>, transform_indices = @transform_3, window_bounds = array<i64: 128, 32>}, {transform_indices = @transform_4, window_bounds = array<i64: 256, 1>}]} {
    %c0 = arith.constant 0 : index
    %c0_0 = arith.constant 0 : index
    %0 = vector.load %arg1[%c0, %c0_0] : memref<256x1xi32, #tpu.memory_space<vmem>>, vector<256x1xi32>
    %c0_1 = arith.constant 0 : index
    %c0_2 = arith.constant 0 : index
    %1 = vector.load %arg2[%c0_1, %c0_2] : memref<256x1xi32, #tpu.memory_space<vmem>>, vector<256x1xi32>
    %2 = tpu.iota {dimensions = array<i32: 1>} : vector<256x64xi32>
    %3 = vector.broadcast %0 : vector<256x1xi32> to vector<256x64xi32>
    %4 = arith.cmpi eq, %2, %3 : vector<256x64xi32>
    %5 = arith.extui %4 : vector<256x64xi1> to vector<256x64xi32>
    %6 = arith.sitofp %5 : vector<256x64xi32> to vector<256x64xf32>
    %7 = tpu.iota {dimensions = array<i32: 1>} : vector<256x128xi32>
    %8 = vector.broadcast %1 : vector<256x1xi32> to vector<256x128xi32>
    %9 = arith.cmpi eq, %7, %8 : vector<256x128xi32>
    %10 = arith.extui %9 : vector<256x128xi1> to vector<256x128xi32>
    %11 = arith.sitofp %10 : vector<256x128xi32> to vector<256x128xf32>
    %c0_3 = arith.constant 0 : index
    %c0_4 = arith.constant 0 : index
    %12 = vector.load %arg3[%c0_3, %c0_4] : memref<64x32xf32, #tpu.memory_space<vmem>>, vector<64x32xf32>
    %cst = arith.constant dense<0.000000e+00> : vector<256x32xf32>
    %13 = tpu.matmul %6, %12, %cst {dimension_numbers = #tpu.dot_dimension_numbers<[1], [0], [0], [1], [0, 0, 1, 1], [], []>} : vector<256x64xf32>, vector<64x32xf32>, vector<256x32xf32> -> vector<256x32xf32>
    %c0_5 = arith.constant 0 : index
    %c0_6 = arith.constant 0 : index
    %14 = vector.load %arg4[%c0_5, %c0_6] : memref<128x32xf32, #tpu.memory_space<vmem>>, vector<128x32xf32>
    %cst_7 = arith.constant dense<0.000000e+00> : vector<256x32xf32>
    %15 = tpu.matmul %11, %14, %cst_7 {dimension_numbers = #tpu.dot_dimension_numbers<[1], [0], [0], [1], [0, 0, 1, 1], [], []>} : vector<256x128xf32>, vector<128x32xf32>, vector<256x32xf32> -> vector<256x32xf32>
    %16 = arith.mulf %13, %15 : vector<256x32xf32>
    %cst_8 = arith.constant dense<0.000000e+00> : vector<256xf32>
    %17 = vector.multi_reduction <add>, %16, %cst_8 [1] : vector<256x32xf32> to vector<256xf32>
    %18 = vector.shape_cast %17 : vector<256xf32> to vector<256x1xf32>
    %c0_9 = arith.constant 0 : index
    %c0_10 = arith.constant 0 : index
    %19 = vector.load %arg5[%c0_9, %c0_10] : memref<256x1xf32, #tpu.memory_space<vmem>>, vector<256x1xf32>
    tpu.vector_store %arg5[%c0_9, %c0_10], %18 {strides = array<i32>} : memref<256x1xf32, #tpu.memory_space<vmem>>, vector<256x1xf32>,
    return
  }
  func.func @transform_0(%arg0: i32) -> (i32, i32) {
    %c0_i32 = arith.constant 0 : i32
    %c0_i32_0 = arith.constant 0 : i32
    return %arg0, %c0_i32 : i32, i32
  }
  func.func @transform_1(%arg0: i32) -> (i32, i32) {
    %c0_i32 = arith.constant 0 : i32
    %c0_i32_0 = arith.constant 0 : i32
    return %arg0, %c0_i32 : i32, i32
  }
  func.func @transform_2(%arg0: i32) -> (i32, i32) {
    %c0_i32 = arith.constant 0 : i32
    %c0_i32_0 = arith.constant 0 : i32
    %c0_i32_1 = arith.constant 0 : i32
    return %c0_i32, %c0_i32_0 : i32, i32
  }
  func.func @transform_3(%arg0: i32) -> (i32, i32) {
    %c0_i32 = arith.constant 0 : i32
    %c0_i32_0 = arith.constant 0 : i32
    %c0_i32_1 = arith.constant 0 : i32
    return %c0_i32, %c0_i32_0 : i32, i32
  }
  func.func @transform_4(%arg0: i32) -> (i32, i32) {
    %c0_i32 = arith.constant 0 : i32
    %c0_i32_0 = arith.constant 0 : i32
    return %arg0, %c0_i32 : i32, i32
  }
}

</mosaic_0001>

<bundles_post_ra>
// kernel: tpu_custom_call.1
= control target key start
LH: loop header
LB: loop body
LE: loop exit
PB: predicated region body
PF: predicated region fallthrough
CT: control target
= control target key end

     0   :  { %s1481_s15 = smov 0   ;;  %s1969_s0 = inlined_call_operand.vmem [shape: s32[512,1], index: 0, kind: input, shape index: {}]   ;;  %s1970_s1 = inlined_call_operand.vmem [shape: s32[512,1], index: 1, kind: input, shape index: {}]   ;;  %s1971_s2 = inlined_call_operand.vmem [shape: f32[64,32], index: 2, kind: input, shape index: {}]   ;;  %s1972_s3 = inlined_call_operand.vmem [shape: f32[128,32], index: 3, kind: input, shape index: {}]   ;;  %s1973_s4 = inlined_call_operand.vmem [shape: f32[512,1], index: 4, kind: output, shape index: {}]  }
   0x1 LB: > { %s1250_s16 = sadd.s32 4294967295, %s1451_s15   ;;  %p1254_p0 = scmp.ge.s32.totalorder %s1451_s15, 1  ;;  %s1451_s15 = sphi %s1481_s15, %s14_s15  }
   0x2   : > { %p174_p1 = scmp.lt.s32.totalorder %s1451_s15, 3 }
   0x4   : > { %p175_p2 = pnand %p1254_p0, %p174_p1 }
   0x5   : > { %s1255_s17 = sshll.u32 (!%p175_p2), %s1250_s16, 5 }
   0x6   : > { %178 = sbr.rel (%p175_p2) target bundleno = 578 (0x242), region = 36  ;;  %p206_p3 = scmp.lt.s32.totalorder (!%p175_p2), %s1255_s17, 63 }
   0xb   : > { %v1453_v0 = vmov 0   ;;  %s1975_s17 = smov (!%p206_p3, %s1255_s17), 63  ;;  %v680_v28 = vld [vmem:[%s1971_s2 + $0x38] sm:$0xff]  ;;  %v679_v29 = vld [vmem:[%s1971_s2 + $0x30] sm:$0xff]  ;;  %v678_v33 = vld [vmem:[%s1971_s2 + $0x28] sm:$0xff]  ;;  %v287_v58 = vlaneseq  ;;  %vm681_vm0 = vcmask 523264  }
   0xc   : > { %1444 = vset.pattern.permute.xlu2 %v1453_v0  ;;  %1443 = vset.pattern.permute.xlu1 %v1453_v0  ;;  %s1489_s18 = sshll.u32 %s1975_s17, 3  ;;  %v677_v34 = vld [vmem:[%s1971_s2 + $0x20] sm:$0xff]  ;;  %v676_v35 = vld [vmem:[%s1971_s2 + $0x18] sm:$0xff]  ;;  %v675_v39 = vld [vmem:[%s1971_s2 + $0x10] sm:$0xff] }
   0xd   : > { %1442 = vset.pattern.permute.xlu0 %v1453_v0  ;;  %s1495_s21 = scalar_lea.vmem %s1969_s0, %s1489_s18  ;;  %s1528_s24 = scalar_lea.vmem %s1970_s1, %s1489_s18  ;;  %786 = vmatpush.msra.mxu0 %v680_v28  ;;  %v674_v40 = vld [vmem:[%s1971_s2 + $0x8] sm:$0xff]  ;;  %v673_v41 = vld [vmem:[%s1971_s2] sm:$0xff]  ;;  %v906_v52 = vld [vmem:[%s1972_s3 + $0x78] sm:$0xff]  ;;  %v1596_v0 = vand.u32 127, %v287_v58 }
   0xe   : > { %v227_v1 = vld [vmem:[%s1495_s21 + $0x20] sm:$0xff]  ;;  %v225_v2 = vld [vmem:[%s1495_s21 + $0x10] sm:$0xff]  ;;  %v228_v4 = vld [vmem:[%s1495_s21 + $0x28] sm:$0xff]  ;;  %1391 = vmatpush.msra.mxu3 %v680_v28  ;;  %907 = vmatpush.msra.mxu1 %v906_v52  ;;  %s1887_s29 = scalar_lea.vmem %s1973_s4, %s1489_s18 }
   0xf   : > { %v223_v3 = vld [vmem:[%s1495_s21] sm:$0xff]  ;;  %302 = vperm.xlu2 %1444, %v227_v1   ;;  %296 = vperm.xlu1 %1443, %v225_v2   ;;  %v226_v5 = vld [vmem:[%s1495_s21 + $0x18] sm:$0xff]  ;;  %v224_v6 = vld [vmem:[%s1495_s21 + $0x8] sm:$0xff] }
  0x10   : > { %290 = vperm.xlu0 %1442, %v223_v3   ;;  %v231_v7 = vld [vmem:[%s1495_s21 + $0x40] sm:$0xff]  ;;  %v230_v8 = vld [vmem:[%s1495_s21 + $0x38] sm:$0xff]  ;;  %v229_v9 = vld [vmem:[%s1495_s21 + $0x30] sm:$0xff]  ;;  %787 = vmatpush.msra.mxu0 %v679_v29 }
  0x11   : > { %v234_v10 = vld [vmem:[%s1495_s21 + $0x58] sm:$0xff]  ;;  %v233_v11 = vld [vmem:[%s1495_s21 + $0x50] sm:$0xff]  ;;  %v232_v12 = vld [vmem:[%s1495_s21 + $0x48] sm:$0xff]  ;;  %1392 = vmatpush.msra.mxu3 %v679_v29  ;;  %1399 = vmatpush.msra.mxu2 %v906_v52 }
  0x12   : > { %v237_v13 = vld [vmem:[%s1495_s21 + $0x70] sm:$0xff]  ;;  %v236_v14 = vld [vmem:[%s1495_s21 + $0x68] sm:$0xff]  ;;  %v235_v15 = vld [vmem:[%s1495_s21 + $0x60] sm:$0xff]  ;;  %788 = vmatpush.msra.mxu0 %v678_v33 }
  0x13   : > { %v240_v16 = vld [vmem:[%s1495_s21 + $0x88] sm:$0xff]  ;;  %v239_v17 = vld [vmem:[%s1495_s21 + $0x80] sm:$0xff]  ;;  %v238_v18 = vld [vmem:[%s1495_s21 + $0x78] sm:$0xff]  ;;  %1393 = vmatpush.msra.mxu3 %v678_v33 }
  0x14   : > { %v243_v19 = vld [vmem:[%s1495_s21 + $0xa0] sm:$0xff]  ;;  %v242_v20 = vld [vmem:[%s1495_s21 + $0x98] sm:$0xff]  ;;  %v241_v21 = vld [vmem:[%s1495_s21 + $0x90] sm:$0xff]  ;;  %789 = vmatpush.msra.mxu0 %v677_v34 }
  0x15   : > { %v246_v22 = vld [vmem:[%s1495_s21 + $0xb8] sm:$0xff]  ;;  %v245_v23 = vld [vmem:[%s1495_s21 + $0xb0] sm:$0xff]  ;;  %v244_v24 = vld [vmem:[%s1495_s21 + $0xa8] sm:$0xff]  ;;  %1394 = vmatpush.msra.mxu3 %v677_v34 }
  0x16   : > { %v249_v25 = vld [vmem:[%s1495_s21 + $0xd0] sm:$0xff]  ;;  %v248_v26 = vld [vmem:[%s1495_s21 + $0xc8] sm:$0xff]  ;;  %v247_v27 = vld [vmem:[%s1495_s21 + $0xc0] sm:$0xff]  ;;  %790 = vmatpush.msra.mxu0 %v676_v35 }
  0x17   : > { %305 = vperm.xlu2 %1444, %v228_v4   ;;  %299 = vperm.xlu1 %1443, %v226_v5   ;;  %v255_v30 = vld [vmem:[%s1528_s24] sm:$0xff]  ;;  %v270_v31 = vld [vmem:[%s1528_s24 + $0x78] sm:$0xff]  ;;  %v272_v36 = vld [vmem:[%s1528_s24 + $0x88] sm:$0xff] }
  0x18   : > { %293 = vperm.xlu0 %1442, %v224_v6   ;;  %v250_v32 = vld [vmem:[%s1495_s21 + $0xd8] sm:$0xff]  ;;  %v256_v37 = vld [vmem:[%s1528_s24 + $0x8] sm:$0xff]  ;;  %v271_v38 = vld [vmem:[%s1528_s24 + $0x80] sm:$0xff]  ;;  %1395 = vmatpush.msra.mxu3 %v676_v35  ;;  %v1454_v6 = vmov 0.0  }
  0x19   : > { %791 = vmatpush.msra.mxu0 %v675_v39  ;;  %v258_v42 = vld [vmem:[%s1528_s24 + $0x18] sm:$0xff]  ;;  %v273_v43 = vld [vmem:[%s1528_s24 + $0x90] sm:$0xff]  ;;  %v275_v46 = vld [vmem:[%s1528_s24 + $0xa0] sm:$0xff] }
  0x1a   : > { %1396 = vmatpush.msra.mxu3 %v675_v39  ;;  %v257_v44 = vld [vmem:[%s1528_s24 + $0x10] sm:$0xff]  ;;  %v259_v47 = vld [vmem:[%s1528_s24 + $0x20] sm:$0xff]  ;;  %v274_v48 = vld [vmem:[%s1528_s24 + $0x98] sm:$0xff] }
  0x1b   : > { %792 = vmatpush.msra.mxu0 %v674_v40  ;;  %v261_v50 = vld [vmem:[%s1528_s24 + $0x30] sm:$0xff]  ;;  %v276_v51 = vld [vmem:[%s1528_s24 + $0xa8] sm:$0xff]  ;;  %v903_v57 = vld [vmem:[%s1972_s3 + $0x60] sm:$0xff] }
  0x1c   : > { %1397 = vmatpush.msra.mxu3 %v674_v40  ;;  %v260_v53 = vld [vmem:[%s1528_s24 + $0x28] sm:$0xff]  ;;  %v905_v54 = vld [vmem:[%s1972_s3 + $0x70] sm:$0xff]  ;;  %v278_v59 = vld [vmem:[%s1528_s24 + $0xb8] sm:$0xff] }
  0x1d   : > { %793 = vmatpush.msra.mxu0 %v673_v41  ;;  %908 = vmatpush.msra.mxu1 %v905_v54  ;;  %v904_v55 = vld [vmem:[%s1972_s3 + $0x68] sm:$0xff]  ;;  %v262_v60 = vld [vmem:[%s1528_s24 + $0x38] sm:$0xff]  ;;  %v277_v62 = vld [vmem:[%s1528_s24 + $0xb0] sm:$0xff] }
  0x1e   : > { %1398 = vmatpush.msra.mxu3 %v673_v41  ;;  %1401 = vmatpush.msra.mxu2 %v905_v54  ;;  %v902_v61 = vld [vmem:[%s1972_s3 + $0x58] sm:$0xff]  ;;  %v901_v63 = vld [vmem:[%s1972_s3 + $0x50] sm:$0xff]  ;;  %v900_v1 = vld [vmem:[%s1972_s3 + $0x48] sm:$0xff] }
  0x1f   : > { %314 = vperm.xlu2 %1444, %v231_v7   ;;  %311 = vperm.xlu1 %1443, %v230_v8   ;;  %v899_v5 = vld [vmem:[%s1972_s3 + $0x40] sm:$0xff]  ;;  %v265_v33 = vld [vmem:[%s1528_s24 + $0x50] sm:$0xff]  ;;  %v254_v39 = vld [vmem:[%s1495_s21 + $0xf8] sm:$0xff] }
  0x20   : > { %308 = vperm.xlu0 %1442, %v229_v9   ;;  %1400 = vmatpush.msrb.mxu3 %v906_v52  ;;  %v279_v8 = vld [vmem:[%s1528_s24 + $0xc0] sm:$0xff]  ;;  %v266_v40 = vld [vmem:[%s1528_s24 + $0x58] sm:$0xff] }
  0x21   : > { %909 = vmatpush.msra.mxu1 %v904_v55  ;;  %1403 = vmatpush.msra.mxu2 %v904_v55  ;;  %v251_v9 = vld [vmem:[%s1495_s21 + $0xe0] sm:$0xff] }
  0x22   : > { %1402 = vmatpush.msrb.mxu3 %v905_v54  ;;  %v891_v28 = vld [vmem:[%s1972_s3] sm:$0xff]  ;;  %v284_v54 = vld [vmem:[%s1528_s24 + $0xe8] sm:$0xff] }
  0x23   : > { %910 = vmatpush.msra.mxu1 %v903_v57  ;;  %1405 = vmatpush.msra.mxu2 %v903_v57 }
  0x24   : > { %1404 = vmatpush.msrb.mxu3 %v904_v55  ;;  %v268_v55 = vld [vmem:[%s1528_s24 + $0x68] sm:$0xff] }
  0x25   : > { %911 = vmatpush.msra.mxu1 %v902_v61  ;;  %1407 = vmatpush.msra.mxu2 %v902_v61 }
  0x26   : > { %1406 = vmatpush.msrb.mxu3 %v903_v57 }
  0x27   : > { %323 = vperm.xlu2 %1444, %v234_v10   ;;  %320 = vperm.xlu1 %1443, %v233_v11   ;;  %v898_v10 = vld [vmem:[%s1972_s3 + $0x38] sm:$0xff]  ;;  %v263_v11 = vld [vmem:[%s1528_s24 + $0x40] sm:$0xff] }
  0x28   : > { %317 = vperm.xlu0 %1442, %v232_v12   ;;  %912 = vmatpush.msra.mxu1 %v901_v63  ;;  %v897_v12 = vld [vmem:[%s1972_s3 + $0x30] sm:$0xff] }
  0x29   : > { %1408 = vmatpush.msrb.mxu3 %v902_v61  ;;  %1409 = vmatpush.msra.mxu2 %v901_v63 }
  0x2a   : > { %913 = vmatpush.msra.mxu1 %v900_v1 }
  0x2b   : > { %1410 = vmatpush.msrb.mxu3 %v901_v63  ;;  %1411 = vmatpush.msra.mxu2 %v900_v1 }
  0x2c   : > { %914 = vmatpush.msra.mxu1 %v899_v5 }
  0x2d   : > { %1412 = vmatpush.msrb.mxu3 %v900_v1  ;;  %1413 = vmatpush.msra.mxu2 %v899_v5 }
  0x2e   : > { %915 = vmatpush.msra.mxu1 %v898_v10 }
  0x2f   : > { %332 = vperm.xlu2 %1444, %v237_v13   ;;  %329 = vperm.xlu1 %1443, %v236_v14   ;;  %v896_v13 = vld [vmem:[%s1972_s3 + $0x28] sm:$0xff] }
  0x30   : > { %326 = vperm.xlu0 %1442, %v235_v15   ;;  %916 = vmatpush.msra.mxu1 %v897_v12 }
  0x31   : > { %1414 = vmatpush.msrb.mxu3 %v899_v5  ;;  %1415 = vmatpush.msra.mxu2 %v898_v10 }
  0x32   : > { %917 = vmatpush.msra.mxu1 %v896_v13 }
  0x33   : > { %1416 = vmatpush.msrb.mxu3 %v898_v10  ;;  %1417 = vmatpush.msra.mxu2 %v897_v12 }
  0x35   : > { %1418 = vmatpush.msrb.mxu3 %v897_v12  ;;  %1419 = vmatpush.msra.mxu2 %v896_v13 }
  0x37   : > { %341 = vperm.xlu2 %1444, %v240_v16   ;;  %338 = vperm.xlu1 %1443, %v239_v17   ;;  %v895_v17 = vld [vmem:[%s1972_s3 + $0x20] sm:$0xff] }
  0x38   : > { %335 = vperm.xlu0 %1442, %v238_v18   ;;  %918 = vmatpush.msra.mxu1 %v895_v17 }
  0x39   : > { %1420 = vmatpush.msrb.mxu3 %v896_v13  ;;  %1421 = vmatpush.msra.mxu2 %v895_v17 }
  0x3b   : > { %1422 = vmatpush.msrb.mxu3 %v895_v17 }
  0x3f   : > { %350 = vperm.xlu2 %1444, %v243_v19   ;;  %347 = vperm.xlu1 %1443, %v242_v20   ;;  %v280_v19 = vld [vmem:[%s1528_s24 + $0xc8] sm:$0xff] }
  0x40   : > { %344 = vperm.xlu0 %1442, %v241_v21   ;;  %v252_v20 = vld [vmem:[%s1495_s21 + $0xe8] sm:$0xff]  ;;  %v894_v21 = vld [vmem:[%s1972_s3 + $0x18] sm:$0xff] }
  0x41   : > { %919 = vmatpush.msra.mxu1 %v894_v21  ;;  %1423 = vmatpush.msra.mxu2 %v894_v21 }
  0x42   : > { %1424 = vmatpush.msrb.mxu3 %v894_v21 }
  0x47   : > { %359 = vperm.xlu2 %1444, %v246_v22   ;;  %356 = vperm.xlu1 %1443, %v245_v23   ;;  %v264_v22 = vld [vmem:[%s1528_s24 + $0x48] sm:$0xff]  ;;  %v893_v23 = vld [vmem:[%s1972_s3 + $0x10] sm:$0xff] }
  0x48   : > { %353 = vperm.xlu0 %1442, %v244_v24   ;;  %920 = vmatpush.msra.mxu1 %v893_v23  ;;  %v892_v24 = vld [vmem:[%s1972_s3 + $0x8] sm:$0xff] }
  0x49   : > { %1425 = vmatpush.msra.mxu2 %v893_v23  ;;  %1426 = vmatpush.msrb.mxu3 %v893_v23 }
  0x4a   : > { %921 = vmatpush.msra.mxu1 %v892_v24 }
  0x4b   : > { %1427 = vmatpush.msra.mxu2 %v892_v24  ;;  %1428 = vmatpush.msrb.mxu3 %v892_v24 }
  0x4c   : > { %922 = vmatpush.msra.mxu1 %v891_v28 }
  0x4d   : > { %1429 = vmatpush.msra.mxu2 %v891_v28  ;;  %1430 = vmatpush.msrb.mxu3 %v891_v28 }
  0x4f   : > { %368 = vperm.xlu2 %1444, %v249_v25   ;;  %365 = vperm.xlu1 %1443, %v248_v26  }
  0x50   : > { %362 = vperm.xlu0 %1442, %v247_v27  }
  0x57   : > { %482 = vperm.xlu2 %1444, %v255_v30   ;;  %527 = vperm.xlu1 %1443, %v270_v31   ;;  %v281_v31 = vld [vmem:[%s1528_s24 + $0xd0] sm:$0xff] }
  0x58   : > { %371 = vperm.xlu0 %1442, %v250_v32   ;;  %v253_v32 = vld [vmem:[%s1495_s21 + $0xf0] sm:$0xff] }
  0x5f   : > { %533 = vperm.xlu2 %1444, %v272_v36   ;;  %485 = vperm.xlu1 %1443, %v256_v37  }
  0x60   : > { %530 = vperm.xlu0 %1442, %v271_v38   ;;  %v282_v38 = vld [vmem:[%s1528_s24 + $0xd8] sm:$0xff] }
  0x67   : > { %491 = vperm.xlu2 %1444, %v258_v42   ;;  %536 = vperm.xlu1 %1443, %v273_v43  }
  0x68   : > { %488 = vperm.xlu0 %1442, %v257_v44  }
  0x69   : > { %v1563_v45 = vpop.permute.xlu2 %302 }
  0x6a   : > { %vm389_vm6 = vcmp.eq.s32.totalorder %v1596_v0, %v1563_v45 }
  0x6b   : > { %v1265_v44 = vsel %vm389_vm6, 1.0, %v1454_v6 }
  0x6f   : > { %542 = vperm.xlu2 %1444, %v275_v46   ;;  %494 = vperm.xlu1 %1443, %v259_v47   ;;  %v285_v46 = vld [vmem:[%s1528_s24 + $0xf0] sm:$0xff]  ;;  %v283_v47 = vld [vmem:[%s1528_s24 + $0xe0] sm:$0xff] }
  0x70   : > { %539 = vperm.xlu0 %1442, %v274_v48   ;;  %v267_v48 = vld [vmem:[%s1528_s24 + $0x60] sm:$0xff] }
  0x71   : > { %v1568_v49 = vpop.permute.xlu2 %305 }
  0x72   : > { %vm390_vm7 = vcmp.eq.s32.totalorder %v1596_v0, %v1568_v49 }
  0x73   : > { %v1266_v52 = vsel %vm390_vm7, 1.0, %v1454_v6 }
  0x77   : > { %500 = vperm.xlu2 %1444, %v261_v50   ;;  %545 = vperm.xlu1 %1443, %v276_v51  }
  0x78   : > { %497 = vperm.xlu0 %1442, %v260_v53   ;;  %v286_v53 = vld [vmem:[%s1528_s24 + $0xf8] sm:$0xff] }
  0x79   : > { %v1582_v56 = vpop.permute.xlu2 %314 }
  0x7a   : > { %vm393_vm13 = vcmp.eq.s32.totalorder %v1596_v0, %v1582_v56 }
  0x7f   : > { %551 = vperm.xlu2 %1444, %v278_v59   ;;  %503 = vperm.xlu1 %1443, %v262_v60   ;;  %v1455_v59 = vmov 1.0  }
  0x80   : > { %548 = vperm.xlu0 %1442, %v277_v62   ;;  %v269_v62 = vld [vmem:[%s1528_s24 + $0x70] sm:$0xff] }
  0x81   : > { %v1601_v2 = vpop.permute.xlu2 %323  ;;  %v1603_v3 = vpop.permute.xlu1 %296 }
  0x82   : > { %v291_v4 = vpop.permute.xlu0 %290  ;;  %vm387_vm3 = vcmp.eq.s32.totalorder %v1596_v0, %v1603_v3  ;;  %vm396_vm7 = vcmp.eq.s32.totalorder %v1596_v0, %v1601_v2 }
  0x83   : > { %vm385_vm1 = vcmp.eq.s32.totalorder %v1596_v0, %v291_v4  ;;  %v1263_v30 = vsel %vm387_vm3, 1.0, %v1454_v6  ;;  %v1272_v23 = vsel %vm396_vm7, 1.0, %v1454_v6 }
  0x84   : > { %v1261_v7 = vsel %vm385_vm1, 1.0, %v1454_v6 }
  0x85   : > { %1325 = vmatmul.msk.f32.vlgmr.msra.gmra.mxu0 %vm681_vm0, %v1261_v7 }
  0x87   : > { %554 = vperm.xlu2 %1444, %v279_v8   ;;  %374 = vperm.xlu1 %1443, %v251_v9   ;;  %v1269_v8 = vsel %vm393_vm13, 1.0, %v1454_v6 }
  0x88   : > { %506 = vperm.xlu0 %1442, %v263_v11  }
  0x89   : > { %v1623_v14 = vpop.permute.xlu2 %332  ;;  %v300_v15 = vpop.permute.xlu1 %299 }
  0x8a   : > { %v294_v16 = vpop.permute.xlu0 %293  ;;  %vm388_vm5 = vcmp.eq.s32.totalorder %v1596_v0, %v300_v15 }
  0x8b   : > { %vm386_vm2 = vcmp.eq.s32.totalorder %v1596_v0, %v294_v16  ;;  %v1264_v37 = vsel %vm388_vm5, 1.0, %v1454_v6 }
  0x8c   : > { %v1262_v18 = vsel %vm386_vm2, 1.0, %v1454_v6 }
  0x8d   : > { %1326 = vmatmul.msk.f32.gmra.mxu0 %vm681_vm0, %v1262_v18 }
  0x8f   : > { %557 = vperm.xlu2 %1444, %v280_v19   ;;  %377 = vperm.xlu1 %1443, %v252_v20  }
  0x90   : > { %509 = vperm.xlu0 %1442, %v264_v22  }
  0x91   : > { %v342_v25 = vpop.permute.xlu2 %341  ;;  %v1645_v26 = vpop.permute.xlu1 %311 }
  0x92   : > { %vm402_vm4 = vcmp.eq.s32.totalorder %v1596_v0, %v342_v25  ;;  %v1648_v27 = vpop.permute.xlu0 %308  ;;  %vm392_vm11 = vcmp.eq.s32.totalorder %v1596_v0, %v1645_v26 }
  0x93   : > { %v1278_v29 = vsel %vm402_vm4, 1.0, %v1454_v6  ;;  %vm391_vm8 = vcmp.eq.s32.totalorder %v1596_v0, %v1648_v27  ;;  %v1268_v3 = vsel %vm392_vm11, 1.0, %v1454_v6 }
  0x94   : > { %1342 = vmatmul.msk.f32.vlgmr.msra.gmra.mxu3 %vm681_vm0, %v1278_v29  ;;  %v1267_v60 = vsel %vm391_vm8, 1.0, %v1454_v6 }
  0x95   : > { %1327 = vmatmul.msk.f32.gmra.mxu0 %vm681_vm0, %v1263_v30 }
  0x97   : > { %560 = vperm.xlu2 %1444, %v281_v31   ;;  %380 = vperm.xlu1 %1443, %v253_v32  }
  0x98   : > { %512 = vperm.xlu0 %1442, %v265_v33  }
  0x99   : > { %v1661_v34 = vpop.permute.xlu2 %350  ;;  %v1663_v35 = vpop.permute.xlu1 %320 }
  0x9a   : > { %v1665_v36 = vpop.permute.xlu0 %317  ;;  %vm405_vm14 = vcmp.eq.s32.totalorder %v1596_v0, %v1661_v34  ;;  %vm395_vm3 = vcmp.eq.s32.totalorder %v1596_v0, %v1663_v35 }
  0x9b   : > { %v1281_v9 = vsel %vm405_vm14, 1.0, %v1454_v6  ;;  %vm394_vm15 = vcmp.eq.s32.totalorder %v1596_v0, %v1665_v36  ;;  %v1271_v18 = vsel %vm395_vm3, 1.0, %v1454_v6 }
  0x9c   : > { %v1270_v12 = vsel %vm394_vm15, 1.0, %v1454_v6 }
  0x9d   : > { %1328 = vmatmul.msk.f32.gmra.mxu0 %vm681_vm0, %v1264_v37 }
  0x9f   : > { %563 = vperm.xlu2 %1444, %v282_v38   ;;  %383 = vperm.xlu1 %1443, %v254_v39  }
  0xa0   : > { %515 = vperm.xlu0 %1442, %v266_v40  }
  0xa1   : > { %v1674_v41 = vpop.permute.xlu2 %359  ;;  %v1676_v42 = vpop.permute.xlu1 %329 }
  0xa2   : > { %v1678_v43 = vpop.permute.xlu0 %326  ;;  %vm408_vm8 = vcmp.eq.s32.totalorder %v1596_v0, %v1674_v41  ;;  %vm398_vm15 = vcmp.eq.s32.totalorder %v1596_v0, %v1676_v42 }
  0xa3   : > { %v1284_v24 = vsel %vm408_vm8, 1.0, %v1454_v6  ;;  %vm397_vm11 = vcmp.eq.s32.totalorder %v1596_v0, %v1678_v43  ;;  %v1274_v31 = vsel %vm398_vm15, 1.0, %v1454_v6 }
  0xa4   : > { %v1273_v27 = vsel %vm397_vm11, 1.0, %v1454_v6 }
  0xa5   : > { %1329 = vmatmul.msk.f32.gmra.mxu0 %vm681_vm0, %v1265_v44 }
  0xa7   : > { %572 = vperm.xlu2 %1444, %v285_v46   ;;  %566 = vperm.xlu1 %1443, %v283_v47  }
  0xa8   : > { %518 = vperm.xlu0 %1442, %v267_v48  }
  0xa9   : > { %v1687_v45 = vpop.permute.xlu2 %368  ;;  %v1689_v50 = vpop.permute.xlu1 %338 }
  0xaa   : > { %v1691_v51 = vpop.permute.xlu0 %335 }
  0xab   : > { %vm400_vm8 = vcmp.eq.s32.totalorder %v1596_v0, %v1691_v51 }
  0xac   : > { %v1276_v39 = vsel %vm400_vm8, 1.0, %v1454_v6 }
  0xad   : > { %1330 = vmatmul.msk.f32.gmra.mxu0 %vm681_vm0, %v1266_v52 }
  0xaf   : > { %575 = vperm.xlu2 %1444, %v286_v53   ;;  %569 = vperm.xlu1 %1443, %v284_v54  }
  0xb0   : > { %521 = vperm.xlu0 %1442, %v268_v55  }
  0xb1   : > { %v483_v49 = vpop.permute.xlu2 %482  ;;  %v348_v57 = vpop.permute.xlu1 %347 }
  0xb2   : > { %vm577_vm9 = vcmp.eq.s32.totalorder %v1596_v0, %v483_v49  ;;  %v345_v58 = vpop.permute.xlu0 %344  ;;  %vm404_vm12 = vcmp.eq.s32.totalorder %v1596_v0, %v348_v57 }
  0xb3   : > { %vm403_vm10 = vcmp.eq.s32.totalorder %v1596_v0, %v345_v58  ;;  %1357 = vmatmul.msk.f32.vlgmr.msra.gmra.mxu1 %vm577_vm9, %v1455_v59  ;;  %v1280_v4 = vsel %vm404_vm12, 1.0, %v1454_v6 }
  0xb4   : > { %v1279_v61 = vsel %vm403_vm10, 1.0, %v1454_v6 }
  0xb5   : > { %1331 = vmatmul.msk.f32.gmra.mxu0 %vm681_vm0, %v1267_v60  ;;  %1343 = vmatmul.msk.f32.gmra.mxu3 %vm681_vm0, %v1279_v61 }
  0xb8   : > { %524 = vperm.xlu0 %1442, %v269_v62  }
  0xb9   : > { %v357_v63 = vpop.permute.xlu1 %356  ;;  %v534_v10 = vpop.permute.xlu2 %533 }
  0xba   : > { %v354_v1 = vpop.permute.xlu0 %353  ;;  %vm407_vm4 = vcmp.eq.s32.totalorder %v1596_v0, %v357_v63  ;;  %vm594_vm9 = vcmp.eq.s32.totalorder %v1596_v0, %v534_v10 }
  0xbb   : > { %vm406_vm1 = vcmp.eq.s32.totalorder %v1596_v0, %v354_v1  ;;  %v1283_v19 = vsel %vm407_vm4, 1.0, %v1454_v6  ;;  %vm399_vm4 = vcmp.eq.s32.totalorder %v1596_v0, %v1623_v14 }
  0xbc   : > { %v1282_v13 = vsel %vm406_vm1, 1.0, %v1454_v6  ;;  %v1275_v36 = vsel %vm399_vm4, 1.0, %v1454_v6 }
  0xbd   : > { %1332 = vmatmul.msk.f32.gmra.mxu0 %vm681_vm0, %v1268_v3  ;;  %1344 = vmatmul.msk.f32.gmra.mxu3 %vm681_vm0, %v1280_v4 }
  0xc1   : > { %v1719_v5 = vpop.permute.xlu1 %365  ;;  %v492_v15 = vpop.permute.xlu2 %491 }
  0xc2   : > { %v363_v7 = vpop.permute.xlu0 %362  ;;  %vm580_vm13 = vcmp.eq.s32.totalorder %v1596_v0, %v492_v15  ;;  %vm410_vm1 = vcmp.eq.s32.totalorder %v1596_v0, %v1719_v5 }
  0xc3   : > { %vm409_vm12 = vcmp.eq.s32.totalorder %v1596_v0, %v363_v7  ;;  %v1286_v32 = vsel %vm410_vm1, 1.0, %v1454_v6 }
  0xc4   : > { %v1285_v28 = vsel %vm409_vm12, 1.0, %v1454_v6  ;;  %vm401_vm12 = vcmp.eq.s32.totalorder %v1596_v0, %v1689_v50 }
  0xc5   : > { %1333 = vmatmul.msk.f32.gmra.mxu0 %vm681_vm0, %v1269_v8  ;;  %1345 = vmatmul.msk.f32.gmra.mxu3 %vm681_vm0, %v1281_v9  ;;  %v1277_v44 = vsel %vm401_vm12, 1.0, %v1454_v6 }
  0xc9   : > { %v528_v56 = vpop.permute.xlu1 %527  ;;  %v543_v20 = vpop.permute.xlu2 %542 }
  0xca   : > { %vm592_vm2 = vcmp.eq.s32.totalorder %v1596_v0, %v528_v56  ;;  %v1729_v11 = vpop.permute.xlu0 %371 }
  0xcb   : > { %1372 = vmatmul.msk.f32.vlgmr.msra.gmra.mxu2 %vm592_vm2, %v1455_v59 }
  0xcd   : > { %1334 = vmatmul.msk.f32.gmra.mxu0 %vm681_vm0, %v1270_v12  ;;  %1346 = vmatmul.msk.f32.gmra.mxu3 %vm681_vm0, %v1282_v13 }
  0xd1   : > { %v486_v16 = vpop.permute.xlu1 %485  ;;  %v501_v26 = vpop.permute.xlu2 %500 }
  0xd2   : > { %vm578_vm5 = vcmp.eq.s32.totalorder %v1596_v0, %v486_v16  ;;  %v531_v17 = vpop.permute.xlu0 %530 }
  0xd3   : > { %vm593_vm6 = vcmp.eq.s32.totalorder %v1596_v0, %v531_v17  ;;  %1358 = vmatmul.msk.f32.gmra.mxu1 %vm578_vm5, %v1455_v59  ;;  %vm411_vm5 = vcmp.eq.s32.totalorder %v1596_v0, %v1687_v45 }
  0xd4   : > { %1373 = vmatmul.msk.f32.gmra.mxu2 %vm593_vm6, %v1455_v59  ;;  %vm597_vm6 = vcmp.eq.s32.totalorder %v1596_v0, %v543_v20  ;;  %v1287_v37 = vsel %vm411_vm5, 1.0, %v1454_v6 }
  0xd5   : > { %1335 = vmatmul.msk.f32.gmra.mxu0 %vm681_vm0, %v1271_v18  ;;  %1347 = vmatmul.msk.f32.gmra.mxu3 %vm681_vm0, %v1283_v19 }
  0xd9   : > { %v537_v21 = vpop.permute.xlu1 %536  ;;  %v552_v33 = vpop.permute.xlu2 %551 }
  0xda   : > { %v489_v22 = vpop.permute.xlu0 %488  ;;  %vm595_vm14 = vcmp.eq.s32.totalorder %v1596_v0, %v537_v21 }
  0xdb   : > { %vm579_vm10 = vcmp.eq.s32.totalorder %v1596_v0, %v489_v22 }
  0xdc   : > { %1359 = vmatmul.msk.f32.gmra.mxu1 %vm579_vm10, %v1455_v59  ;;  %1374 = vmatmul.msk.f32.gmra.mxu2 %vm594_vm9, %v1455_v59  ;;  %vm412_vm9 = vcmp.eq.s32.totalorder %v1596_v0, %v1729_v11  ;;  %vm583_vm10 = vcmp.eq.s32.totalorder %v1596_v0, %v501_v26 }
  0xdd   : > { %1336 = vmatmul.msk.f32.gmra.mxu0 %vm681_vm0, %v1272_v23  ;;  %1348 = vmatmul.msk.f32.gmra.mxu3 %vm681_vm0, %v1284_v24  ;;  %v1288_v40 = vsel %vm412_vm9, 1.0, %v1454_v6 }
  0xe1   : > { %v495_v2 = vpop.permute.xlu1 %494  ;;  %v555_v14 = vpop.permute.xlu2 %554 }
  0xe2   : > { %v540_v25 = vpop.permute.xlu0 %539  ;;  %vm581_vm2 = vcmp.eq.s32.totalorder %v1596_v0, %v495_v2  ;;  %vm601_vm5 = vcmp.eq.s32.totalorder %v1596_v0, %v555_v14 }
  0xe3   : > { %vm596_vm3 = vcmp.eq.s32.totalorder %v1596_v0, %v540_v25 }
  0xe4   : > { %1360 = vmatmul.msk.f32.gmra.mxu1 %vm580_vm13, %v1455_v59  ;;  %1375 = vmatmul.msk.f32.gmra.mxu2 %vm595_vm14, %v1455_v59 }
  0xe5   : > { %1337 = vmatmul.msk.f32.gmra.mxu0 %vm681_vm0, %v1273_v27  ;;  %1349 = vmatmul.msk.f32.gmra.mxu3 %vm681_vm0, %v1285_v28 }
  0xe9   : > { %v546_v29 = vpop.permute.xlu1 %545  ;;  %v558_v42 = vpop.permute.xlu2 %557 }
  0xea   : > { %v498_v30 = vpop.permute.xlu0 %497  ;;  %vm598_vm11 = vcmp.eq.s32.totalorder %v1596_v0, %v546_v29  ;;  %vm602_vm8 = vcmp.eq.s32.totalorder %v1596_v0, %v558_v42 }
  0xeb   : > { %vm582_vm7 = vcmp.eq.s32.totalorder %v1596_v0, %v498_v30 }
  0xec   : > { %1361 = vmatmul.msk.f32.gmra.mxu1 %vm581_vm2, %v1455_v59  ;;  %1376 = vmatmul.msk.f32.gmra.mxu2 %vm596_vm3, %v1455_v59  ;;  %vm600_vm2 = vcmp.eq.s32.totalorder %v1596_v0, %v552_v33 }
  0xed   : > { %1338 = vmatmul.msk.f32.gmra.mxu0 %vm681_vm0, %v1274_v31  ;;  %1350 = vmatmul.msk.f32.gmra.mxu3 %vm681_vm0, %v1286_v32 }
  0xf1   : > { %v504_v34 = vpop.permute.xlu1 %503  ;;  %v561_v48 = vpop.permute.xlu2 %560 }
  0xf2   : > { %v549_v35 = vpop.permute.xlu0 %548  ;;  %vm584_vm14 = vcmp.eq.s32.totalorder %v1596_v0, %v504_v34 }
  0xf3   : > { %vm599_vm15 = vcmp.eq.s32.totalorder %v1596_v0, %v549_v35 }
  0xf4   : > { %1362 = vmatmul.msk.f32.gmra.mxu1 %vm582_vm7, %v1455_v59  ;;  %1377 = vmatmul.msk.f32.gmra.mxu2 %vm597_vm6, %v1455_v59 }
  0xf5   : > { %1339 = vmatmul.msk.f32.gmra.mxu0 %vm681_vm0, %v1275_v36  ;;  %1351 = vmatmul.msk.f32.gmra.mxu3 %vm681_vm0, %v1287_v37 }
  0xf9   : > { %v375_v38 = vpop.permute.xlu1 %374  ;;  %v564_v53 = vpop.permute.xlu2 %563 }
  0xfa   : > { %v507_v41 = vpop.permute.xlu0 %506  ;;  %vm413_vm13 = vcmp.eq.s32.totalorder %v1596_v0, %v375_v38 }
  0xfb   : > { %v1289_v46 = vsel %vm413_vm13, 1.0, %v1454_v6  ;;  %vm585_vm3 = vcmp.eq.s32.totalorder %v1596_v0, %v507_v41  ;;  %vm604_vm13 = vcmp.eq.s32.totalorder %v1596_v0, %v564_v53 }
  0xfc   : > { %1363 = vmatmul.msk.f32.gmra.mxu1 %vm583_vm10, %v1455_v59  ;;  %1378 = vmatmul.msk.f32.gmra.mxu2 %vm598_vm11, %v1455_v59  ;;  %vm603_vm10 = vcmp.eq.s32.totalorder %v1596_v0, %v561_v48 }
  0xfd   : > { %1340 = vmatmul.msk.f32.gmra.mxu0 %vm681_vm0, %v1276_v39  ;;  %1352 = vmatmul.msk.f32.gmra.mxu3 %vm681_vm0, %v1288_v40 }
 0x101   : > { %v378_v43 = vpop.permute.xlu1 %377  ;;  %v573_v58 = vpop.permute.xlu2 %572 }
 0x102   : > { %v510_v47 = vpop.permute.xlu0 %509  ;;  %vm414_vm1 = vcmp.eq.s32.totalorder %v1596_v0, %v378_v43  ;;  %v795_v57 = vpop.f32.mrf.mxu0  ;;  %vm607_vm12 = vcmp.eq.s32.totalorder %v1596_v0, %v573_v58 }
 0x103   : > { %v1290_v45 = vsel %vm414_vm1, 1.0, %v1454_v6  ;;  %vm586_vm6 = vcmp.eq.s32.totalorder %v1596_v0, %v510_v47 }
 0x104   : > { %1364 = vmatmul.msk.f32.gmra.mxu1 %vm584_vm14, %v1455_v59  ;;  %1379 = vmatmul.msk.f32.gmra.mxu2 %vm599_vm15, %v1455_v59  ;;  %vm1052_vm15 = vcmask 261120  }
 0x105   : > { %1341 = vmatmul.msk.f32.gmra.mxu0 %vm681_vm0, %v1277_v44  ;;  %1353 = vmatmul.msk.f32.gmra.mxu3 %vm681_vm0, %v1289_v46 }
 0x109   : > { %v381_v50 = vpop.permute.xlu1 %380  ;;  %v576_v61 = vpop.permute.xlu2 %575 }
 0x10a   : > { %v513_v51 = vpop.permute.xlu0 %512  ;;  %vm415_vm4 = vcmp.eq.s32.totalorder %v1596_v0, %v381_v50  ;;  %vm608_vm14 = vcmp.eq.s32.totalorder %v1596_v0, %v576_v61 }
 0x10b   : > { %v1291_v52 = vsel %vm415_vm4, 1.0, %v1454_v6  ;;  %vm587_vm9 = vcmp.eq.s32.totalorder %v1596_v0, %v513_v51 }
 0x10c   : > { %1365 = vmatmul.msk.f32.gmra.mxu1 %vm585_vm3, %v1455_v59  ;;  %1380 = vmatmul.msk.f32.gmra.mxu2 %vm600_vm2, %v1455_v59 }
 0x10d   : > { %1354 = vmatmul.msk.f32.gmra.mxu3 %vm681_vm0, %v1290_v45 }
 0x111   : > { %v384_v54 = vpop.permute.xlu1 %383 }
 0x112   : > { %vm416_vm7 = vcmp.eq.s32.totalorder %v1596_v0, %v384_v54  ;;  %v516_v55 = vpop.permute.xlu0 %515 }
 0x113   : > { %v1292_v49 = vsel %vm416_vm7, 1.0, %v1454_v6  ;;  %vm588_vm11 = vcmp.eq.s32.totalorder %v1596_v0, %v516_v55  ;;  %v798_v6 = vpop.f32.mrf.mxu0 }
 0x114   : > { %1366 = vmatmul.msk.f32.gmra.mxu1 %vm586_vm6, %v1455_v59  ;;  %1381 = vmatmul.msk.f32.gmra.mxu2 %vm601_vm5, %v1455_v59  ;;  %vm1149_vm5 = vcmask 7168  }
 0x115   : > { %1355 = vmatmul.msk.f32.gmra.mxu3 %vm681_vm0, %v1291_v52 }
 0x117   : > { %v846_v1 = vpop.f32.mrf.mxu3 }
 0x119   : > { %v567_v62 = vpop.permute.xlu1 %566 }
 0x11a   : > { %v519_v60 = vpop.permute.xlu0 %518  ;;  %vm605_vm1 = vcmp.eq.s32.totalorder %v1596_v0, %v567_v62 }
 0x11b   : > { %v801_v4 = vpop.f32.mrf.mxu0 }
 0x11c   : > { %1367 = vmatmul.msk.f32.gmra.mxu1 %vm587_vm9, %v1455_v59  ;;  %1382 = vmatmul.msk.f32.gmra.mxu2 %vm602_vm8, %v1455_v59 }
 0x11d   : > { %1356 = vmatmul.msk.f32.gmra.mxu3 %vm681_vm0, %v1292_v49  ;;  %vm589_vm0 = vcmp.eq.s32.totalorder %v1596_v0, %v519_v60 }
 0x121   : > { %v570_v8 = vpop.permute.xlu1 %569 }
 0x122   : > { %v522_v63 = vpop.permute.xlu0 %521  ;;  %vm606_vm3 = vcmp.eq.s32.totalorder %v1596_v0, %v570_v8 }
 0x123   : > { %vm590_vm2 = vcmp.eq.s32.totalorder %v1596_v0, %v522_v63  ;;  %v804_v56 = vpop.f32.mrf.mxu0 }
 0x124   : > { %1368 = vmatmul.msk.f32.gmra.mxu1 %vm588_vm11, %v1455_v59  ;;  %1383 = vmatmul.msk.f32.gmra.mxu2 %vm603_vm10, %v1455_v59 }
 0x125   : > { %1387 = vmatmul.msk.f32.vlgmr.msrb.gmra.mxu3 %vm607_vm12, %v1455_v59 }
 0x12a   : > { %v525_v9 = vpop.permute.xlu0 %524 }
 0x12b   : > { %vm591_vm4 = vcmp.eq.s32.totalorder %v1596_v0, %v525_v9  ;;  %v807_v12 = vpop.f32.mrf.mxu0 }
 0x12c   : > { %1369 = vmatmul.msk.f32.gmra.mxu1 %vm589_vm0, %v1455_v59  ;;  %1384 = vmatmul.msk.f32.gmra.mxu2 %vm604_vm13, %v1455_v59 }
 0x12d   : > { %1388 = vmatmul.msk.f32.gmra.mxu3 %vm608_vm14, %v1455_v59 }
 0x130   : > { %v924_v3 = vpop.f32.mrf.mxu1 }
 0x131   : > { %v1020_v5 = vmul.f32 %v924_v3, %v795_v57 }
 0x133   : > { %v1053_v7 = vsel %vm1052_vm15, %v1020_v5, 0.0  ;;  %v810_v16 = vpop.f32.mrf.mxu0 }
 0x134   : > { %1370 = vmatmul.msk.f32.gmra.mxu1 %vm590_vm2, %v1455_v59  ;;  %1385 = vmatmul.msk.f32.gmra.mxu2 %vm605_vm1, %v1455_v59 }
 0x135   : > { %1054 = vadd.xlane.f32.xlu1 %v1053_v7 }
 0x138   : > { %v849_v10 = vpop.f32.mrf.mxu3 }
 0x13b   : > { %v813_v0 = vpop.f32.mrf.mxu0 }
 0x13c   : > { %1371 = vmatmul.msk.f32.gmra.mxu1 %vm591_vm4, %v1455_v59  ;;  %1386 = vmatmul.msk.f32.gmra.mxu2 %vm606_vm3, %v1455_v59 }
 0x140   : > { %v852_v11 = vpop.f32.mrf.mxu3 }
 0x143   : > { %v816_v29 = vpop.f32.mrf.mxu0 }
 0x148   : > { %v855_v13 = vpop.f32.mrf.mxu3 }
 0x14b   : > { %v819_v38 = vpop.f32.mrf.mxu0 }
 0x14e   : > { %v1859_v15 = vpop.f32.mrf.mxu2 }
 0x150   : > { %v858_v17 = vpop.f32.mrf.mxu3  ;;  %v927_v18 = vpop.f32.mrf.mxu1 }
 0x151   : > { %v1021_v19 = vmul.f32 %v927_v18, %v798_v6 }
 0x153   : > { %v1056_v20 = vsel %vm1052_vm15, %v1021_v19, 0.0  ;;  %v822_v47 = vpop.f32.mrf.mxu0 }
 0x154   : > { %1057 = vadd.xlane.f32.xlu2 %v1056_v20 }
 0x157   : > { %v1862_v21 = vpop.f32.mrf.mxu2 }
 0x158   : > { %v861_v22 = vpop.f32.mrf.mxu3 }
 0x159   : > { %v930_v23 = vpop.f32.mrf.mxu1 }
 0x15a   : > { %v1022_v24 = vmul.f32 %v930_v23, %v801_v4 }
 0x15b   : > { %v825_v57 = vpop.f32.mrf.mxu0 }
 0x15c   : > { %v1059_v59 = vsel %vm1052_vm15, %v1022_v24, 0.0 }
 0x15d   : > { %1060 = vadd.xlane.f32.xlu0 %v1059_v59 }
 0x15f   : > { %v975_v2 = vpop.f32.mrf.mxu2 }
 0x160   : > { %v1037_v25 = vmul.f32 %v975_v2, %v846_v1  ;;  %v864_v26 = vpop.f32.mrf.mxu3 }
 0x161   : > { %v933_v27 = vpop.f32.mrf.mxu1 }
 0x162   : > { %v1104_v28 = vsel %vm1052_vm15, %v1037_v25, 0.0  ;;  %v1023_v30 = vmul.f32 %v933_v27, %v804_v56 }
 0x163   : > { %1105 = vadd.xlane.f32.xlu2 %v1104_v28  ;;  %v828_v5 = vpop.f32.mrf.mxu0 }
 0x164   : > { %v1062_v36 = vsel %vm1052_vm15, %v1023_v30, 0.0 }
 0x167   : > { %v978_v31 = vpop.f32.mrf.mxu2 }
 0x168   : > { %v1038_v32 = vmul.f32 %v978_v31, %v849_v10  ;;  %v867_v37 = vpop.f32.mrf.mxu3 }
 0x169   : > { %v936_v33 = vpop.f32.mrf.mxu1 }
 0x16a   : > { %v1024_v34 = vmul.f32 %v936_v33, %v807_v12  ;;  %v1107_v35 = vsel %vm1052_vm15, %v1038_v32, 0.0 }
 0x16b   : > { %1108 = vadd.xlane.f32.xlu0 %v1107_v35  ;;  %1063 = vadd.xlane.f32.xlu2 %v1062_v36 }
 0x16c   : > { %v1065_v14 = vsel %vm1052_vm15, %v1024_v34, 0.0 }
 0x16d   : > { %1066 = vadd.xlane.f32.xlu1 %v1065_v14 }
 0x16f   : > { %v981_v39 = vpop.f32.mrf.mxu2 }
 0x170   : > { %v1039_v40 = vmul.f32 %v981_v39, %v852_v11  ;;  %v870_v46 = vpop.f32.mrf.mxu3 }
 0x171   : > { %v939_v41 = vpop.f32.mrf.mxu1 }
 0x172   : > { %v1025_v42 = vmul.f32 %v939_v41, %v810_v16  ;;  %v1110_v43 = vsel %vm1052_vm15, %v1039_v40, 0.0 }
 0x174   : > { %v1068_v44 = vsel %vm1052_vm15, %v1025_v42, 0.0 }
 0x175   : > { %1111 = vadd.xlane.f32.xlu1 %v1110_v43  ;;  %1069 = vadd.xlane.f32.xlu2 %v1068_v44 }
 0x177   : > { %v984_v48 = vpop.f32.mrf.mxu2 }
 0x178   : > { %v1040_v45 = vmul.f32 %v984_v48, %v855_v13  ;;  %v873_v54 = vpop.f32.mrf.mxu3 }
 0x179   : > { %v942_v50 = vpop.f32.mrf.mxu1 }
 0x17a   : > { %v1026_v51 = vmul.f32 %v942_v50, %v813_v0  ;;  %v1113_v52 = vsel %vm1052_vm15, %v1040_v45, 0.0 }
 0x17c   : > { %v1071_v53 = vsel %vm1052_vm15, %v1026_v51, 0.0 }
 0x17d   : > { %1114 = vadd.xlane.f32.xlu2 %v1113_v52  ;;  %1072 = vadd.xlane.f32.xlu0 %v1071_v53 }
 0x17f   : > { %v987_v55 = vpop.f32.mrf.mxu2 }
 0x180   : > { %v1041_v49 = vmul.f32 %v987_v55, %v858_v17  ;;  %v876_v1 = vpop.f32.mrf.mxu3  ;;  %v831_v17 = vpop.f32.mrf.mxu0 }
 0x181   : > { %v945_v58 = vpop.f32.mrf.mxu1 }
 0x182   : > { %v1027_v60 = vmul.f32 %v945_v58, %v816_v29  ;;  %v1116_v6 = vsel %vm1052_vm15, %v1041_v49, 0.0 }
 0x184   : > { %v1074_v61 = vsel %vm1052_vm15, %v1027_v60, 0.0 }
 0x185   : > { %1117 = vadd.xlane.f32.xlu0 %v1116_v6  ;;  %1075 = vadd.xlane.f32.xlu1 %v1074_v61 }
 0x187   : > { %v990_v62 = vpop.f32.mrf.mxu2 }
 0x188   : > { %v1042_v63 = vmul.f32 %v990_v62, %v861_v22  ;;  %v879_v12 = vpop.f32.mrf.mxu3  ;;  %v834_v59 = vpop.f32.mrf.mxu0 }
 0x189   : > { %v948_v3 = vpop.f32.mrf.mxu1 }
 0x18a   : > { %v1028_v4 = vmul.f32 %v948_v3, %v819_v38  ;;  %v1119_v7 = vsel %vm1052_vm15, %v1042_v63, 0.0 }
 0x18c   : > { %v1077_v8 = vsel %vm1052_vm15, %v1028_v4, 0.0 }
 0x18d   : > { %1120 = vadd.xlane.f32.xlu1 %v1119_v7  ;;  %1078 = vadd.xlane.f32.xlu2 %v1077_v8 }
 0x18f   : > { %v993_v9 = vpop.f32.mrf.mxu2 }
 0x190   : > { %v1043_v10 = vmul.f32 %v993_v9, %v864_v26  ;;  %v882_v24 = vpop.f32.mrf.mxu3  ;;  %v837_v34 = vpop.f32.mrf.mxu0 }
 0x191   : > { %v951_v56 = vpop.f32.mrf.mxu1 }
 0x192   : > { %v1029_v11 = vmul.f32 %v951_v56, %v822_v47  ;;  %v1122_v13 = vsel %vm1052_vm15, %v1043_v10, 0.0 }
 0x194   : > { %v1080_v16 = vsel %vm1052_vm15, %v1029_v11, 0.0 }
 0x195   : > { %1123 = vadd.xlane.f32.xlu2 %v1122_v13  ;;  %1081 = vadd.xlane.f32.xlu0 %v1080_v16 }
 0x197   : > { %v996_v18 = vpop.f32.mrf.mxu2 }
 0x198   : > { %v1044_v19 = vmul.f32 %v996_v18, %v867_v37  ;;  %v885_v30 = vpop.f32.mrf.mxu3  ;;  %v840_v43 = vpop.f32.mrf.mxu0 }
 0x199   : > { %v954_v20 = vpop.f32.mrf.mxu1  ;;  %v1035_v48 = vmul.f32 %v1859_v15, %v840_v43 }
 0x19a   : > { %v1030_v22 = vmul.f32 %v954_v20, %v825_v57  ;;  %v1125_v0 = vsel %vm1052_vm15, %v1044_v19, 0.0 }
 0x19b   : > { %v1098_v53 = vsel %vm1052_vm15, %v1035_v48, 0.0 }
 0x19c   : > { %v1083_v23 = vsel %vm1052_vm15, %v1030_v22, 0.0 }
 0x19d   : > { %1126 = vadd.xlane.f32.xlu0 %v1125_v0  ;;  %1084 = vadd.xlane.f32.xlu1 %v1083_v23 }
 0x19f   : > { %v999_v2 = vpop.f32.mrf.mxu2 }
 0x1a0   : > { %v1045_v25 = vmul.f32 %v999_v2, %v870_v46  ;;  %v888_v40 = vpop.f32.mrf.mxu3  ;;  %v843_v49 = vpop.f32.mrf.mxu0 }
 0x1a1   : > { %v957_v26 = vpop.f32.mrf.mxu1  ;;  %v1036_v58 = vmul.f32 %v1862_v21, %v843_v49 }
 0x1a2   : > { %v1031_v27 = vmul.f32 %v957_v26, %v828_v5  ;;  %v1128_v28 = vsel %vm1052_vm15, %v1045_v25, 0.0 }
 0x1a3   : > { %v1101_v61 = vsel %vm1052_vm15, %v1036_v58, 0.0 }
 0x1a4   : > { %v1086_v29 = vsel %vm1052_vm15, %v1031_v27, 0.0 }
 0x1a5   : > { %1129 = vadd.xlane.f32.xlu1 %v1128_v28  ;;  %1087 = vadd.xlane.f32.xlu2 %v1086_v29 }
 0x1a7   : > { %v1002_v31 = vpop.f32.mrf.mxu2 }
 0x1a8   : > { %v1046_v32 = vmul.f32 %v1002_v31, %v873_v54  ;;  %v1055_v33 = vpop.xlane.xlu1 %1054  ;;  %v1014_v52 = vpop.f32.mrf.mxu3 }
 0x1a9   : > { %1150 = vst.msk [vmem:[%s1887_s29] sm:$0xff] %vm1149_vm5, %v1055_v33  ;;  %v960_v35 = vpop.f32.mrf.mxu1  ;;  %v1050_v15 = vmul.f32 %v1014_v52, %v885_v30 }
 0x1aa   : > { %v1032_v36 = vmul.f32 %v960_v35, %v831_v17  ;;  %v1131_v37 = vsel %vm1052_vm15, %v1046_v32, 0.0 }
 0x1ab   : > { %v1143_v6 = vsel %vm1052_vm15, %v1050_v15, 0.0 }
 0x1ac   : > { %v1089_v14 = vsel %vm1052_vm15, %v1032_v36, 0.0 }
 0x1ad   : > { %1132 = vadd.xlane.f32.xlu2 %v1131_v37  ;;  %1090 = vadd.xlane.f32.xlu0 %v1089_v14 }
 0x1af   : > { %v1005_v38 = vpop.f32.mrf.mxu2 }
 0x1b0   : > { %v1047_v39 = vmul.f32 %v1005_v38, %v876_v1  ;;  %v1017_v62 = vpop.f32.mrf.mxu3 }
 0x1b1   : > { %v963_v41 = vpop.f32.mrf.mxu1  ;;  %v1051_v3 = vmul.f32 %v1017_v62, %v888_v40 }
 0x1b2   : > { %v1033_v42 = vmul.f32 %v963_v41, %v834_v59  ;;  %v1134_v44 = vsel %vm1052_vm15, %v1047_v39, 0.0 }
 0x1b3   : > { %v1146_v21 = vsel %vm1052_vm15, %v1051_v3, 0.0 }
 0x1b4   : > { %v1092_v46 = vsel %vm1052_vm15, %v1033_v42, 0.0 }
 0x1b5   : > { %1135 = vadd.xlane.f32.xlu0 %v1134_v44  ;;  %1093 = vadd.xlane.f32.xlu1 %v1092_v46 }
 0x1b7   : > { %v1008_v47 = vpop.f32.mrf.mxu2 }
 0x1b8   : > { %v1048_v45 = vmul.f32 %v1008_v47, %v879_v12 }
 0x1b9   : > { %v966_v50 = vpop.f32.mrf.mxu1 }
 0x1ba   : > { %v1034_v51 = vmul.f32 %v966_v50, %v837_v34  ;;  %v1137_v54 = vsel %vm1052_vm15, %v1048_v45, 0.0 }
 0x1bc   : > { %v1095_v55 = vsel %vm1052_vm15, %v1034_v51, 0.0 }
 0x1bd   : > { %1099 = vadd.xlane.f32.xlu0 %v1098_v53  ;;  %1138 = vadd.xlane.f32.xlu1 %v1137_v54 }
 0x1be   : > { %1096 = vadd.xlane.f32.xlu2 %v1095_v55 }
 0x1bf   : > { %v1011_v57 = vpop.f32.mrf.mxu2 }
 0x1c0   : > { %v1049_v60 = vmul.f32 %v1011_v57, %v882_v24 }
 0x1c2   : > { %v1140_v63 = vsel %vm1052_vm15, %v1049_v60, 0.0 }
 0x1c5   : > { %1144 = vadd.xlane.f32.xlu0 %v1143_v6  ;;  %1102 = vadd.xlane.f32.xlu1 %v1101_v61 }
 0x1c6   : > { %1141 = vadd.xlane.f32.xlu2 %v1140_v63 }
 0x1c7   : > { %v1058_v1 = vpop.xlane.xlu2 %1057 }
 0x1c8   : > { %1151 = vst.msk [vmem:[%s1887_s29 + $0x8] sm:$0xff] %vm1149_vm5, %v1058_v1 }
 0x1cd   : > { %1147 = vadd.xlane.f32.xlu1 %v1146_v21 }
 0x1d0   : > { %v1061_v4 = vpop.xlane.xlu0 %1060 }
 0x1d1   : > { %1152 = vst.msk [vmem:[%s1887_s29 + $0x10] sm:$0xff] %vm1149_vm5, %v1061_v4 }
 0x1d6   : > { %v1106_v5 = vpop.xlane.xlu2 %1105 }
 0x1d7   : > { %1167 = vst.msk [vmem:[%s1887_s29 + $0x88] sm:$0xff] %vm1149_vm5, %v1106_v5 }
 0x1de   : > { %v1064_v7 = vpop.xlane.xlu2 %1063  ;;  %v1109_v8 = vpop.xlane.xlu0 %1108 }
 0x1df   : > { %1153 = vst.msk [vmem:[%s1887_s29 + $0x18] sm:$0xff] %vm1149_vm5, %v1064_v7 }
 0x1e0   : > { %1168 = vst.msk [vmem:[%s1887_s29 + $0x90] sm:$0xff] %vm1149_vm5, %v1109_v8  ;;  %v1067_v9 = vpop.xlane.xlu1 %1066 }
 0x1e1   : > { %1154 = vst.msk [vmem:[%s1887_s29 + $0x20] sm:$0xff] %vm1149_vm5, %v1067_v9 }
 0x1e8   : > { %v1112_v10 = vpop.xlane.xlu1 %1111  ;;  %v1070_v56 = vpop.xlane.xlu2 %1069 }
 0x1e9   : > { %1169 = vst.msk [vmem:[%s1887_s29 + $0x98] sm:$0xff] %vm1149_vm5, %v1112_v10 }
 0x1ea   : > { %1155 = vst.msk [vmem:[%s1887_s29 + $0x28] sm:$0xff] %vm1149_vm5, %v1070_v56 }
 0x1f0   : > { %v1115_v11 = vpop.xlane.xlu2 %1114  ;;  %v1073_v12 = vpop.xlane.xlu0 %1072 }
 0x1f1   : > { %1170 = vst.msk [vmem:[%s1887_s29 + $0xa0] sm:$0xff] %vm1149_vm5, %v1115_v11 }
 0x1f2   : > { %1156 = vst.msk [vmem:[%s1887_s29 + $0x30] sm:$0xff] %vm1149_vm5, %v1073_v12 }
 0x1f8   : > { %v1076_v13 = vpop.xlane.xlu1 %1075  ;;  %v1118_v16 = vpop.xlane.xlu0 %1117 }
 0x1f9   : > { %1157 = vst.msk [vmem:[%s1887_s29 + $0x38] sm:$0xff] %vm1149_vm5, %v1076_v13 }
 0x1fa   : > { %1171 = vst.msk [vmem:[%s1887_s29 + $0xa8] sm:$0xff] %vm1149_vm5, %v1118_v16 }
 0x200   : > { %v1121_v17 = vpop.xlane.xlu1 %1120  ;;  %v1079_v18 = vpop.xlane.xlu2 %1078 }
 0x201   : > { %1172 = vst.msk [vmem:[%s1887_s29 + $0xb0] sm:$0xff] %vm1149_vm5, %v1121_v17 }
 0x202   : > { %1158 = vst.msk [vmem:[%s1887_s29 + $0x40] sm:$0xff] %vm1149_vm5, %v1079_v18 }
 0x208   : > { %v1124_v19 = vpop.xlane.xlu2 %1123  ;;  %v1082_v20 = vpop.xlane.xlu0 %1081 }
 0x209   : > { %1173 = vst.msk [vmem:[%s1887_s29 + $0xb8] sm:$0xff] %vm1149_vm5, %v1124_v19 }
 0x20a   : > { %1159 = vst.msk [vmem:[%s1887_s29 + $0x48] sm:$0xff] %vm1149_vm5, %v1082_v20 }
 0x210   : > { %v1085_v22 = vpop.xlane.xlu1 %1084  ;;  %v1127_v0 = vpop.xlane.xlu0 %1126 }
 0x211   : > { %1160 = vst.msk [vmem:[%s1887_s29 + $0x50] sm:$0xff] %vm1149_vm5, %v1085_v22 }
 0x212   : > { %1174 = vst.msk [vmem:[%s1887_s29 + $0xc0] sm:$0xff] %vm1149_vm5, %v1127_v0 }
 0x218   : > { %v1130_v23 = vpop.xlane.xlu1 %1129  ;;  %v1088_v24 = vpop.xlane.xlu2 %1087 }
 0x219   : > { %1175 = vst.msk [vmem:[%s1887_s29 + $0xc8] sm:$0xff] %vm1149_vm5, %v1130_v23 }
 0x21a   : > { %1161 = vst.msk [vmem:[%s1887_s29 + $0x58] sm:$0xff] %vm1149_vm5, %v1088_v24 }
 0x220   : > { %v1133_v59 = vpop.xlane.xlu2 %1132  ;;  %v1091_v2 = vpop.xlane.xlu0 %1090 }
 0x221   : > { %1176 = vst.msk [vmem:[%s1887_s29 + $0xd0] sm:$0xff] %vm1149_vm5, %v1133_v59 }
 0x222   : > { %1162 = vst.msk [vmem:[%s1887_s29 + $0x60] sm:$0xff] %vm1149_vm5, %v1091_v2 }
 0x228   : > { %v1094_v25 = vpop.xlane.xlu1 %1093  ;;  %v1136_v26 = vpop.xlane.xlu0 %1135 }
 0x229   : > { %1163 = vst.msk [vmem:[%s1887_s29 + $0x68] sm:$0xff] %vm1149_vm5, %v1094_v25 }
 0x22a   : > { %1177 = vst.msk [vmem:[%s1887_s29 + $0xd8] sm:$0xff] %vm1149_vm5, %v1136_v26 }
 0x230   : > { %v1139_v27 = vpop.xlane.xlu1 %1138  ;;  %v1100_v28 = vpop.xlane.xlu0 %1099 }
 0x231   : > { %1178 = vst.msk [vmem:[%s1887_s29 + $0xe0] sm:$0xff] %vm1149_vm5, %v1139_v27  ;;  %v1097_v29 = vpop.xlane.xlu2 %1096 }
 0x232   : > { %1164 = vst.msk [vmem:[%s1887_s29 + $0x70] sm:$0xff] %vm1149_vm5, %v1097_v29 }
 0x233   : > { %1165 = vst.msk [vmem:[%s1887_s29 + $0x78] sm:$0xff] %vm1149_vm5, %v1100_v28 }
 0x238   : > { %v1103_v30 = vpop.xlane.xlu1 %1102  ;;  %v1145_v31 = vpop.xlane.xlu0 %1144 }
 0x239   : > { %1166 = vst.msk [vmem:[%s1887_s29 + $0x80] sm:$0xff] %vm1149_vm5, %v1103_v30  ;;  %v1142_v32 = vpop.xlane.xlu2 %1141 }
 0x23a   : > { %1179 = vst.msk [vmem:[%s1887_s29 + $0xe8] sm:$0xff] %vm1149_vm5, %v1142_v32 }
 0x23b   : > { %1180 = vst.msk [vmem:[%s1887_s29 + $0xf0] sm:$0xff] %vm1149_vm5, %v1145_v31 }
 0x240   : > { %v1148_v33 = vpop.xlane.xlu1 %1147 }
 0x241   : > { %1181 = vst.msk [vmem:[%s1887_s29 + $0xf8] sm:$0xff] %vm1149_vm5, %v1148_v33 }
 0x242 PF: > { %s14_s15 = sadd.s32 1, %s1451_s15  }
 0x243   : > { %p11_p4 = scmp.ge.s32.totalorder %s14_s15, 4  }
 0x245   :  { %13 = sbr.rel (!%p11_p4) target bundleno = 1 (0x1), region = 69 }

</bundles_post_ra>
